<compile_context>
chip_gen: v6e
topology: v6e:2x2x1
jax: 0.10.0
libtpu: 0.0.40
codegen_flags: <defaults>
</compile_context>

<pallas_src>
import functools
import math

import jax
import jax.numpy as jnp
from jax import lax
from jax.experimental import pallas as pl
from jax.experimental.pallas import tpu as pltpu


def _pick_tile(n, preferred):
    """Largest preferred tile that evenly divides n, else the full extent."""
    for t in preferred:
        if t <= n and n % t == 0:
            return t
    return n


# ----------------------------------------------------------------------------
# Kernel 1: fused QKV projection (lane-dense, full-width MXU matmuls).
#   x tile (tm, D) @ w (D, H*d) -> q/k/v tiles (tm, H*d), bf16 outputs.
# ----------------------------------------------------------------------------
def _qkv_kernel(x_ref, wq_ref, wk_ref, wv_ref, q_ref, k_ref, v_ref):
    x = x_ref[...].astype(wq_ref.dtype)                       # bf16 MXU operand
    q_ref[...] = jnp.dot(x, wq_ref[...],
                         preferred_element_type=jnp.float32).astype(q_ref.dtype)
    k_ref[...] = jnp.dot(x, wk_ref[...],
                         preferred_element_type=jnp.float32).astype(k_ref.dtype)
    v_ref[...] = jnp.dot(x, wv_ref[...],
                         preferred_element_type=jnp.float32).astype(v_ref.dtype)


def qkv_projection(x, w_q, w_k, w_v, *, tm):
    B, N, D = x.shape
    inner = w_q.shape[1]
    grid = (B, N // tm)
    x_spec = pl.BlockSpec((pl.Squeezed(), tm, D), lambda b, i: (b, i, 0))
    w_spec = pl.BlockSpec((D, inner), lambda b, i: (0, 0))     # resident weights
    o_spec = pl.BlockSpec((pl.Squeezed(), tm, inner), lambda b, i: (b, i, 0))
    out_sd = jax.ShapeDtypeStruct((B, N, inner), w_q.dtype)
    return pl.pallas_call(
        _qkv_kernel,
        out_shape=(out_sd, out_sd, out_sd),
        grid=grid,
        in_specs=[x_spec, w_spec, w_spec, w_spec],
        out_specs=(o_spec, o_spec, o_spec),
        compiler_params=pltpu.CompilerParams(
            dimension_semantics=("parallel", "parallel")),
    )(x, w_q, w_k, w_v)


# ----------------------------------------------------------------------------
# Kernel 2: flash attention + fused output projection.
#   grid = (B, N//tq, N//tkv), kv axis last + "arbitrary".
# ----------------------------------------------------------------------------
def _flash_outproj_kernel(q_ref, k_ref, v_ref, wo_ref, b_ref, o_ref,
                          m_ref, l_ref, acc_ref, oacc_ref,
                          *, heads, dim_head, tkv, kv_resident):
    ki = pl.program_id(2)

    @pl.when(ki == 0)
    def _():
        m_ref[...] = jnp.full(m_ref.shape, -jnp.inf, dtype=jnp.float32)
        l_ref[...] = jnp.zeros_like(l_ref)
        acc_ref[...] = jnp.zeros_like(acc_ref)

    d = dim_head
    for h in range(heads):                                     # static unroll
        q_h = q_ref[:, h * d:(h + 1) * d]                      # (tq, d) bf16
        if kv_resident:
            start = pl.multiple_of(ki * tkv, tkv)
            k_h = k_ref[pl.ds(start, tkv), h * d:(h + 1) * d]  # (tkv, d) bf16
            v_h = v_ref[pl.ds(start, tkv), h * d:(h + 1) * d]
        else:
            k_h = k_ref[:, h * d:(h + 1) * d]
            v_h = v_ref[:, h * d:(h + 1) * d]
        # Scores: contract last dims of both operands (no k.T); softmax scale is
        # pre-folded into w_q, so q arrives already scaled.
        s = lax.dot_general(q_h, k_h, (((1,), (1,)), ((), ())),
                            preferred_element_type=jnp.float32)  # (tq, tkv) f32
        m_prev = m_ref[h]
        m_new = jnp.maximum(m_prev, jnp.max(s, axis=-1, keepdims=True))
        alpha = jnp.exp(m_prev - m_new)
        p = jnp.exp(s - m_new)
        l_ref[h] = alpha * l_ref[h] + jnp.sum(p, axis=-1, keepdims=True)
        acc_ref[h] = alpha * acc_ref[h] + jnp.dot(
            p.astype(v_h.dtype), v_h, preferred_element_type=jnp.float32)
        m_ref[h] = m_new
    # TODO(synk): dropout p>0 not implemented (p=0.0 -> identity, eval semantics)

    @pl.when(ki == pl.num_programs(2) - 1)
    def _():
        # Fused head-merge + output projection into a resident f32 VMEM accumulator
        # (avoids the (B,H,N,d) HBM round-trip and a huge vreg-resident Python acc).
        oacc_ref[...] = jnp.zeros_like(oacc_ref)
        for h in range(heads):
            inv = pl.reciprocal(l_ref[h], approx=True)          # (tq, 1) on EUP
            a_h = (acc_ref[h] * inv).astype(wo_ref.dtype)       # (tq, d) bf16
            oacc_ref[...] += jnp.dot(a_h, wo_ref[h],
                                     preferred_element_type=jnp.float32)
        o_ref[...] = (oacc_ref[...] + b_ref[...]).astype(o_ref.dtype)


def flash_attention_outproj(q, k, v, w_out, b_out, *, out_dtype, tq, tkv,
                            kv_resident_budget_bytes=16 * 1024 * 1024):
    B, N, inner = q.shape
    H, d, D = w_out.shape
    # K + V resident per batch (double-buffered by the pipeline) if they fit;
    # on v7x (64 MiB VMEM) a 16 MiB budget leaves ample headroom.
    kv_resident = 2 * 2 * N * inner * q.dtype.itemsize <= kv_resident_budget_bytes
    grid = (B, N // tq, N // tkv)

    q_spec = pl.BlockSpec((pl.Squeezed(), tq, inner), lambda b, qi, ki: (b, qi, 0))
    if kv_resident:
        kv_spec = pl.BlockSpec((pl.Squeezed(), N, inner), lambda b, qi, ki: (b, 0, 0))
    else:
        kv_spec = pl.BlockSpec((pl.Squeezed(), tkv, inner), lambda b, qi, ki: (b, ki, 0))
    wo_spec = pl.BlockSpec((H, d, D), lambda b, qi, ki: (0, 0, 0))
    b_spec = pl.BlockSpec((1, D), lambda b, qi, ki: (0, 0))
    o_spec = pl.BlockSpec((pl.Squeezed(), tq, D), lambda b, qi, ki: (b, qi, 0))

    kernel = functools.partial(_flash_outproj_kernel, heads=H, dim_head=d,
                               tkv=tkv, kv_resident=kv_resident)
    return pl.pallas_call(
        kernel,
        out_shape=jax.ShapeDtypeStruct((B, N, D), out_dtype),
        grid=grid,
        in_specs=[q_spec, kv_spec, kv_spec, wo_spec, b_spec],
        out_specs=o_spec,
        scratch_shapes=[pltpu.VMEM((H, tq, 1), jnp.float32),   # running max m
                        pltpu.VMEM((H, tq, 1), jnp.float32),   # running denom l
                        pltpu.VMEM((H, tq, d), jnp.float32),   # per-head p@v accum
                        pltpu.VMEM((tq, D), jnp.float32)],     # out-proj accum
        compiler_params=pltpu.CompilerParams(
            dimension_semantics=("parallel", "parallel", "arbitrary")),
    )(q, k, v, w_out, b_out)


# ----------------------------------------------------------------------------
# Attention module (matches the PyTorch forward pass, eval / p=0.0 semantics)
# ----------------------------------------------------------------------------
class Attention:
    def __init__(self, dim, heads=8, dim_head=64, dropout=0.0, *, key,
                 compute_dtype=jnp.bfloat16):
        inner_dim = dim_head * heads
        self.heads = heads
        self.dim_head = dim_head
        self.dim = dim
        self.scale = dim_head ** (-0.5)
        self.project_out = not (heads == 1 and dim_head == dim)
        self.compute_dtype = compute_dtype

        k1, k2, k3 = jax.random.split(key, 3)
        # nn.Linear-style init (uniform bound 1/sqrt(fan_in)), stored as (in, out).
        bound_qkv = 1.0 / math.sqrt(dim)
        self.w_qkv = jax.random.uniform(
            k1, (dim, inner_dim * 3), jnp.float32, -bound_qkv, bound_qkv)
        wq, wk, wv = jnp.split(self.w_qkv, 3, axis=1)          # each (dim, inner)
        # Kernel weights: bf16, softmax scale folded into w_q (init-time, free).
        self.w_q_k = (wq * self.scale).astype(compute_dtype)
        self.w_k_k = wk.astype(compute_dtype)
        self.w_v_k = wv.astype(compute_dtype)

        if self.project_out:
            bound_out = 1.0 / math.sqrt(inner_dim)
            self.w_out_flat = jax.random.uniform(
                k2, (inner_dim, dim), jnp.float32, -bound_out, bound_out)
            self.b_out_flat = jax.random.uniform(
                k3, (dim,), jnp.float32, -bound_out, bound_out)
        else:
            # Identity projection (heads == 1 and dim_head == dim): exact no-op.
            self.w_out_flat = jnp.eye(inner_dim, dtype=jnp.float32)
            self.b_out_flat = jnp.zeros((dim,), jnp.float32)
        # Per-head out-proj weights (H, d, dim) absorb 'b h n d -> b n (h d)'.
        self.w_out_k = self.w_out_flat.reshape(heads, dim_head, dim).astype(compute_dtype)
        self.b_out_k = self.b_out_flat.reshape(1, dim).astype(jnp.float32)
        # TODO(synk): dropout p>0 not implemented (p=0.0 -> identity, eval semantics)

    def __call__(self, x):
        B, N, D = x.shape
        tm = _pick_tile(N, (256, 128))
        tq = _pick_tile(N, (128,))
        tkv = _pick_tile(N, (256, 128))

        # Fused lane-dense qkv projection -> bf16 (B, N, H*d) q, k, v.
        q, k, v = qkv_projection(x, self.w_q_k, self.w_k_k, self.w_v_k, tm=tm)
        # Flash attention with fused head-merge + output projection + bias.
        return flash_attention_outproj(q, k, v, self.w_out_k, self.b_out_k,
                                       out_dtype=x.dtype, tq=tq, tkv=tkv)


# ----------------------------------------------------------------------------
# Pure-JAX reference (f32) for correctness check
# ----------------------------------------------------------------------------
def reference_attention(module, x):
    B, N, D = x.shape
    H, d = module.heads, module.dim_head
    inner = H * d
    qkv = x @ module.w_qkv
    q, k, v = jnp.split(qkv, 3, axis=-1)
    q = q.reshape(B, N, H, d).transpose(0, 2, 1, 3)
    k = k.reshape(B, N, H, d).transpose(0, 2, 1, 3)
    v = v.reshape(B, N, H, d).transpose(0, 2, 1, 3)
    dots = jnp.einsum("bhnd,bhmd->bhnm", q, k) * module.scale
    attn = jax.nn.softmax(dots, axis=-1)
    out = jnp.einsum("bhnm,bhmd->bhnd", attn, v)
    out = out.transpose(0, 2, 1, 3).reshape(B, N, inner)
    if module.project_out:
        out = out @ module.w_out_flat + module.b_out_flat
    return out


if __name__ == "__main__":
    key = jax.random.PRNGKey(0)
    k_param, k_x = jax.random.split(key)

    B, N, dim = 2, 8, 32
    heads, dim_head = 4, 16

    module = Attention(dim, heads=heads, dim_head=dim_head, dropout=0.0, key=k_param)
    x = jax.random.normal(k_x, (B, N, dim), dtype=jnp.float32)

    out = module(x)
    out = jax.block_until_ready(out)

    ref = reference_attention(module, x)
    assert out.shape == (B, N, dim), out.shape
    max_err = float(jnp.max(jnp.abs(out - ref)))
    # bf16 q/k/v/weights + approx reciprocal -> loosened tolerance vs f32 reference.
    assert jnp.allclose(out, ref, atol=3e-2, rtol=3e-2), max_err
    print("KERNEL_OK")
</pallas_src>

<mosaic_0001>
module attributes {stable_mosaic.version = 11 : i64} {
  func.func @_qkv_kernel(%arg0: i32, %arg1: i32, %arg2: memref<1x8x32xf32, #tpu.memory_space<vmem>>, %arg3: memref<32x64xbf16, #tpu.memory_space<vmem>>, %arg4: memref<32x64xbf16, #tpu.memory_space<vmem>>, %arg5: memref<32x64xbf16, #tpu.memory_space<vmem>>, %arg6: memref<1x8x64xbf16, #tpu.memory_space<vmem>>, %arg7: memref<1x8x64xbf16, #tpu.memory_space<vmem>>, %arg8: memref<1x8x64xbf16, #tpu.memory_space<vmem>>) attributes {dimension_semantics = [#tpu.dimension_semantics<parallel>, #tpu.dimension_semantics<parallel>], iteration_bounds = array<i64: 2, 1>, scalar_prefetch = 0 : i64, scratch_operands = 0 : i64, tpu.core_type = #tpu.core_type<tc>, window_params = [{transform_indices = @transform_0, window_bounds = array<i64: 1, 8, 32>}, {pipeline_mode = #tpu.pipeline_mode<synchronous>, transform_indices = @transform_1, window_bounds = array<i64: 32, 64>}, {pipeline_mode = #tpu.pipeline_mode<synchronous>, transform_indices = @transform_2, window_bounds = array<i64: 32, 64>}, {pipeline_mode = #tpu.pipeline_mode<synchronous>, transform_indices = @transform_3, window_bounds = array<i64: 32, 64>}, {transform_indices = @transform_4, window_bounds = array<i64: 1, 8, 64>}, {transform_indices = @transform_5, window_bounds = array<i64: 1, 8, 64>}, {transform_indices = @transform_6, window_bounds = array<i64: 1, 8, 64>}]} {
    %c0 = arith.constant 0 : index
    %c0_0 = arith.constant 0 : index
    %c0_1 = arith.constant 0 : index
    %0 = vector.load %arg2[%c0, %c0_0, %c0_1] : memref<1x8x32xf32, #tpu.memory_space<vmem>>, vector<1x8x32xf32>
    %1 = vector.shape_cast %0 : vector<1x8x32xf32> to vector<8x32xf32>
    %2 = arith.truncf %1 : vector<8x32xf32> to vector<8x32xbf16>
    %c0_2 = arith.constant 0 : index
    %c0_3 = arith.constant 0 : index
    %3 = vector.load %arg3[%c0_2, %c0_3] : memref<32x64xbf16, #tpu.memory_space<vmem>>, vector<32x64xbf16>
    %cst = arith.constant dense<0.000000e+00> : vector<8x64xf32>
    %4 = tpu.matmul %2, %3, %cst {dimension_numbers = #tpu.dot_dimension_numbers<[1], [0], [0], [1], [0, 0, 1, 1], [], []>} : vector<8x32xbf16>, vector<32x64xbf16>, vector<8x64xf32> -> vector<8x64xf32>
    %5 = arith.truncf %4 : vector<8x64xf32> to vector<8x64xbf16>
    %c0_4 = arith.constant 0 : index
    %c0_5 = arith.constant 0 : index
    %c0_6 = arith.constant 0 : index
    %6 = vector.load %arg6[%c0_4, %c0_5, %c0_6] : memref<1x8x64xbf16, #tpu.memory_space<vmem>>, vector<1x8x64xbf16>
    %7 = vector.shape_cast %6 : vector<1x8x64xbf16> to vector<8x64xbf16>
    %8 = vector.shape_cast %5 : vector<8x64xbf16> to vector<1x8x64xbf16>
    tpu.vector_store %arg6[%c0_4, %c0_5, %c0_6], %8 {strides = array<i32>} : memref<1x8x64xbf16, #tpu.memory_space<vmem>>, vector<1x8x64xbf16>,
    %c0_7 = arith.constant 0 : index
    %c0_8 = arith.constant 0 : index
    %9 = vector.load %arg4[%c0_7, %c0_8] : memref<32x64xbf16, #tpu.memory_space<vmem>>, vector<32x64xbf16>
    %cst_9 = arith.constant dense<0.000000e+00> : vector<8x64xf32>
    %10 = tpu.matmul %2, %9, %cst_9 {dimension_numbers = #tpu.dot_dimension_numbers<[1], [0], [0], [1], [0, 0, 1, 1], [], []>} : vector<8x32xbf16>, vector<32x64xbf16>, vector<8x64xf32> -> vector<8x64xf32>
    %11 = arith.truncf %10 : vector<8x64xf32> to vector<8x64xbf16>
    %c0_10 = arith.constant 0 : index
    %c0_11 = arith.constant 0 : index
    %c0_12 = arith.constant 0 : index
    %12 = vector.load %arg7[%c0_10, %c0_11, %c0_12] : memref<1x8x64xbf16, #tpu.memory_space<vmem>>, vector<1x8x64xbf16>
    %13 = vector.shape_cast %12 : vector<1x8x64xbf16> to vector<8x64xbf16>
    %14 = vector.shape_cast %11 : vector<8x64xbf16> to vector<1x8x64xbf16>
    tpu.vector_store %arg7[%c0_10, %c0_11, %c0_12], %14 {strides = array<i32>} : memref<1x8x64xbf16, #tpu.memory_space<vmem>>, vector<1x8x64xbf16>,
    %c0_13 = arith.constant 0 : index
    %c0_14 = arith.constant 0 : index
    %15 = vector.load %arg5[%c0_13, %c0_14] : memref<32x64xbf16, #tpu.memory_space<vmem>>, vector<32x64xbf16>
    %cst_15 = arith.constant dense<0.000000e+00> : vector<8x64xf32>
    %16 = tpu.matmul %2, %15, %cst_15 {dimension_numbers = #tpu.dot_dimension_numbers<[1], [0], [0], [1], [0, 0, 1, 1], [], []>} : vector<8x32xbf16>, vector<32x64xbf16>, vector<8x64xf32> -> vector<8x64xf32>
    %17 = arith.truncf %16 : vector<8x64xf32> to vector<8x64xbf16>
    %c0_16 = arith.constant 0 : index
    %c0_17 = arith.constant 0 : index
    %c0_18 = arith.constant 0 : index
    %18 = vector.load %arg8[%c0_16, %c0_17, %c0_18] : memref<1x8x64xbf16, #tpu.memory_space<vmem>>, vector<1x8x64xbf16>
    %19 = vector.shape_cast %18 : vector<1x8x64xbf16> to vector<8x64xbf16>
    %20 = vector.shape_cast %17 : vector<8x64xbf16> to vector<1x8x64xbf16>
    tpu.vector_store %arg8[%c0_16, %c0_17, %c0_18], %20 {strides = array<i32>} : memref<1x8x64xbf16, #tpu.memory_space<vmem>>, vector<1x8x64xbf16>,
    return
  }
  func.func @transform_0(%arg0: i32, %arg1: i32) -> (i32, i32, i32) {
    %c0_i32 = arith.constant 0 : i32
    %c0_i32_0 = arith.constant 0 : i32
    return %arg0, %arg1, %c0_i32 : i32, i32, i32
  }
  func.func @transform_1(%arg0: i32, %arg1: i32) -> (i32, i32) {
    %c0_i32 = arith.constant 0 : i32
    %c0_i32_0 = arith.constant 0 : i32
    %c0_i32_1 = arith.constant 0 : i32
    return %c0_i32, %c0_i32_0 : i32, i32
  }
  func.func @transform_2(%arg0: i32, %arg1: i32) -> (i32, i32) {
    %c0_i32 = arith.constant 0 : i32
    %c0_i32_0 = arith.constant 0 : i32
    %c0_i32_1 = arith.constant 0 : i32
    return %c0_i32, %c0_i32_0 : i32, i32
  }
  func.func @transform_3(%arg0: i32, %arg1: i32) -> (i32, i32) {
    %c0_i32 = arith.constant 0 : i32
    %c0_i32_0 = arith.constant 0 : i32
    %c0_i32_1 = arith.constant 0 : i32
    return %c0_i32, %c0_i32_0 : i32, i32
  }
  func.func @transform_4(%arg0: i32, %arg1: i32) -> (i32, i32, i32) {
    %c0_i32 = arith.constant 0 : i32
    %c0_i32_0 = arith.constant 0 : i32
    return %arg0, %arg1, %c0_i32 : i32, i32, i32
  }
  func.func @transform_5(%arg0: i32, %arg1: i32) -> (i32, i32, i32) {
    %c0_i32 = arith.constant 0 : i32
    %c0_i32_0 = arith.constant 0 : i32
    return %arg0, %arg1, %c0_i32 : i32, i32, i32
  }
  func.func @transform_6(%arg0: i32, %arg1: i32) -> (i32, i32, i32) {
    %c0_i32 = arith.constant 0 : i32
    %c0_i32_0 = arith.constant 0 : i32
    return %arg0, %arg1, %c0_i32 : i32, i32, i32
  }
}

</mosaic_0001>

<bundles_post_ra>
// kernel: tpu_custom_call.1
= control target key start
LH: loop header
LB: loop body
LE: loop exit
PB: predicated region body
PF: predicated region fallthrough
CT: control target
= control target key end

     0   :  { %s1505_s0 = inlined_call_operand.hbm [shape: f32[2,8,32], index: 0, kind: input, shape index: {}]   ;;  %s1506_s1 = inlined_call_operand.hbm [shape: bf16[32,64], index: 1, kind: input, shape index: {}]   ;;  %s1507_s2 = inlined_call_operand.hbm [shape: bf16[32,64], index: 2, kind: input, shape index: {}]   ;;  %s1508_s3 = inlined_call_operand.hbm [shape: bf16[32,64], index: 3, kind: input, shape index: {}]   ;;  %s1509_s4 = inlined_call_operand.hbm [shape: bf16[2,8,64], index: 4, kind: output, shape index: {0}]   ;;  %s1510_s5 = inlined_call_operand.hbm [shape: bf16[2,8,64], index: 5, kind: output, shape index: {1}]   ;;  %s1511_s6 = inlined_call_operand.hbm [shape: bf16[2,8,64], index: 6, kind: output, shape index: {2}]  }
   0x1   :  { %1515 = sst [smem:[#allocation19_spill]] %s1506_s1 }
   0x2   :  { %1516 = sst [smem:[#allocation20_spill]] %s1507_s2 }
   0x3   :  { %12 = vsyncpa [#allocation3], 0 }
   0x4   :  { %14 = vsyncpa [#allocation3 + $0x1], 0 }
   0x5   :  { %15 = vsyncpa [#allocation6], 0 }
   0x6   :  { %16 = vsyncpa [#allocation9], 0 }
   0x7   :  { %17 = vsyncpa [#allocation4], 0 }
   0x8   :  { %19 = vsyncpa [#allocation4 + $0x1], 0 }
   0x9   :  { %20 = vsyncpa [#allocation12], 0 }
   0xa   :  { %22 = vsyncpa [#allocation12 + $0x1], 0  ;;  %s1235_s21 = smov 0   ;;  %s1237_s22 = smov 0  }
   0xb   :  { %s1239_s23 = smov 0   ;;  %s1241_s24 = smov 0  }
   0xc   :  { %s1243_s25 = smov 0   ;;  %s1245_s26 = smov 0  }
   0xd LB: > { %s1266_s27 = sadd.s32 4294967295, %s1187_s26   ;;  %s1514_s28 = sadd.s32 4294967294, %s1187_s26   ;;  %s1187_s26 = sphi %s1245_s26, %s28_s26   ;;  %s1183_s25 = sphi %s1243_s25, %s1539_s25   ;;  %s1179_s24 = sphi %s1241_s24, %s1538_s24   ;;  %s1175_s23 = sphi %s1239_s23, %s1537_s23   ;;  %s1171_s22 = sphi %s1237_s22, %s1536_s22   ;;  %s1167_s21 = sphi %s1235_s21, %s1535_s21  }
   0xe   : > { %p62_p0 = scmp.ne.s32.totalorder %s1171_s22, %s1167_s21  ;;  %p1512_p1 = scmp.eq.s32.totalorder %s1266_s27, 0 }
   0xf   : > { %p157_p3 = scmp.eq.s32.totalorder %s1514_s28, 1  ;;  %p759_p5 = scmp.ge.s32.totalorder %s1187_s26, 1 }
  0x10   : > { %p1277_p4 = por %p1512_p1, %p62_p0  ;;  %p220_p7 = scmp.lt.s32.totalorder %s1187_s26, 3 }
  0x11   : > { %p1282_p6 = por %p157_p3, %p62_p0  ;;  %s1189_s8 = smov [#allocation5]  }
  0x12   : > { %s1517_s29 = scalar_select %p1277_p4, 1, 0 }
  0x13   : > { %s1518_s30 = scalar_select %p1282_p6, 1, 0 }
  0x14   : > { %p1287_p8 = pnand %p759_p5, %p220_p7  ;;  %s232_s9 = sshll.u32 %s1189_s8, 4  ;;  %s233_s9 = int_to_ptr.vmem [resolvable:$true] %s232_s9 }
  0x15   : > { %s1190_s11 = smov [#allocation7]   ;;  %s1191_s13 = smov [#allocation8]  }
  0x16   : > { %p844_p9 = pneg %p1287_p8  ;;  %s245_s12 = sshll.u32 %s1190_s11, 4  ;;  %s246_s12 = int_to_ptr.vmem [resolvable:$true] %s245_s12 }
  0x17   : > { %s258_s14 = sshll.u32 %s1191_s13, 4  ;;  %s948_s15 = scalar_lea.vmem %s233_s9, 256  ;;  %s259_s14 = int_to_ptr.vmem [resolvable:$true] %s258_s14 }
  0x18   : > { %p1296_p11 = pnand %p844_p9, %p1512_p1  ;;  %p949_p13 = scmp.ne.s32.totalorder %s233_s9, %s948_s15 }
  0x19   : > { %p956_p5 = scmp.lt.s32.totalorder %s233_s9, %s233_s9  ;;  %p957_p7 = scmp.lt.s32.totalorder %s948_s15, %s948_s15 }
  0x1a   : > { %p939_p12 = pneg %p1296_p11 }
  0x1b   : > { %p958_p9 = por %p957_p7, %p956_p5 }
  0x1c   : > { %p951_p0 = pnand %p949_p13, %p939_p12 }
  0x1e   : > { %p952_p3 = pneg %p951_p0 }
  0x20   : > { %p959_p10 = pnand %p958_p9, %p952_p3 }
  0x22   : > { %962 = shalt.err (!%p959_p10)
}
  0x23   : > { %s1192_s16 = smov 64   ;;  %s1193_s17 = smov 4  }
  0x24   : > { %s1521_s1 = sld [smem:[#allocation19_spill]]  ;;  %s974_s20 = scalar_lea.vmem %s246_s12, 256 }
  0x25   : > { %p975_p1 = scmp.ne.s32.totalorder %s246_s12, %s974_s20  ;;  %p982_p2 = scmp.lt.s32.totalorder %s246_s12, %s246_s12 }
  0x26   : > { %p983_p6 = scmp.lt.s32.totalorder %s974_s20, %s974_s20 }
  0x27   : > { %p977_p13 = pnand %p975_p1, %p939_p12 }
  0x28   : > { %p984_p5 = por %p983_p6, %p982_p2 }
  0x29   : > { %p978_p0 = pneg %p977_p13 }
  0x2a   : > { %847 = dma.hbm_to_vmem [thread:$0]  (!%p1296_p11), %s1521_s1, 256, %s233_s9, [#allocation6], %s1192_s16, %s1192_s16, %s1193_s17  }
  0x2b   : > { %p985_p3 = pnand %p984_p5, %p978_p0 }
  0x2d   : > { %988 = shalt.err (!%p985_p3)
}
  0x2e   : > { %s1522_s2 = sld [smem:[#allocation20_spill]]  ;;  %s1000_s9 = scalar_lea.vmem %s259_s14, 256 }
  0x2f   : > { %p1001_p10 = scmp.ne.s32.totalorder %s259_s14, %s1000_s9  ;;  %p1008_p9 = scmp.lt.s32.totalorder %s259_s14, %s259_s14 }
  0x30   : > { %p1009_p13 = scmp.lt.s32.totalorder %s1000_s9, %s1000_s9 }
  0x31   : > { %p1003_p7 = pnand %p1001_p10, %p939_p12 }
  0x32   : > { %p1010_p4 = por %p1009_p13, %p1008_p9 }
  0x33   : > { %p1004_p1 = pneg %p1003_p7 }
  0x34   : > { %850 = dma.hbm_to_vmem [thread:$0]  (!%p1296_p11), %s1522_s2, 256, %s246_s12, [#allocation6], %s1192_s16, %s1192_s16, %s1193_s17  }
  0x35   : > { %p1011_p2 = pnand %p1010_p4, %p1004_p1 }
  0x37   : > { %1014 = shalt.err (!%p1011_p2)
}
  0x38   : > { %853 = dma.hbm_to_vmem [thread:$0]  (!%p1296_p11), %s1508_s3, 256, %s259_s14, [#allocation9], %s1192_s16, %s1192_s16, %s1193_s17  }
  0x39   : > { %s49_s12 = sadd.s32 1, %s1175_s23  ;;  %s40_s18 = sadd.s32 1, %s1183_s25 }
  0x3a   : > { %p56_p4 = scmp.ne.s32.totalorder %s1175_s23, %s1171_s22  ;;  %p42_p6 = scmp.ge.s32.totalorder %s40_s18, 2 }
  0x3b   : > { %p57_p12 = scmp.eq.s32.totalorder %s1187_s26, 0  ;;  %p1523_p0 = scmp.eq.s32.totalorder %s1266_s27, 1 }
  0x3c   : > { %p871_p3 = scmp.lt.s32.totalorder %s1187_s26, 2  ;;  %s1541_s18 = smov (%p42_p6, %s40_s18), 0 }
  0x3d   : > { %p1333_p5 = por %p1523_p0, %p56_p4  ;;  %p58_p10 = por %p57_p12, %p56_p4 }
  0x3e   : > { %s272_s19 = sand.u32 1, %s1175_s23   ;;  %s44_s20 = ssub.s32 %s1183_s25, %s1541_s18 }
  0x3f   : > { %p47_p7 = scmp.eq.s32.totalorder %s44_s20, 0  ;;  %s764_s14 = sshll.u32 %s272_s19, 3 }
  0x40   : > { %s765_s16 = sshll.u32 %s1183_s25, 7  ;;  %s276_s13 = scalar_lea.vmem [#allocation2], %s764_s14 }
  0x41   : > { %s1345_s17 = scalar_select %p47_p7, %s1175_s23, %s49_s12  }
  0x42   : > { %s282_s9 = scalar_lea.hbm %s1505_s0, %s765_s16  ;;  %s284_s15 = sshll.u32 %s276_s13, 4  ;;  %s285_s15 = int_to_ptr.vmem [resolvable:$true] %s284_s15 }
  0x43   : > { %p1352_p11 = pnand %p871_p3, %p58_p10  ;;  %s273_s1 = scalar_lea.sflag [#allocation3], %s272_s19 }
  0x44   : > { %s1028_s20 = scalar_lea.vmem %s285_s15, 128  ;;  %s1194_s12 = smov [#allocation2]  }
  0x45   : > { %p1017_p1 = pneg %p1352_p11  ;;  %p1029_p9 = scmp.ne.s32.totalorder %s285_s15, %s1028_s20 }
  0x46   : > { %s1033_s2 = sshll.u32 %s1194_s12, 4  ;;  %s1034_s2 = int_to_ptr.vmem [resolvable:$false] %s1033_s2 }
  0x47   : > { %p1031_p13 = pnand %p1029_p9, %p1017_p1  ;;  %s1035_s16 = scalar_lea.vmem %s1034_s2, 256 }
  0x48   : > { %p1036_p4 = scmp.lt.s32.totalorder %s285_s15, %s1034_s2  ;;  %p1037_p6 = scmp.lt.s32.totalorder %s1035_s16, %s1028_s20 }
  0x49   : > { %p1032_p2 = pneg %p1031_p13 }
  0x4a   : > { %p1038_p12 = por %p1037_p6, %p1036_p4 }
  0x4c   : > { %p1039_p0 = pnand %p1038_p12, %p1032_p2 }
  0x4e   : > { %1042 = shalt.err (!%p1039_p0)
}
  0x4f   : > { %857 = dma.hbm_to_vmem [thread:$0]  (!%p1352_p11), %s282_s9, 128, %s285_s15, %s273_s1  }
  0x50   : > { %293 = sbr.rel (%p1287_p8) target bundleno = 358 (0x166), region = 36  ;;  %s1363_s19 = sand.u32 (!%p1287_p8), 1, %s1171_s22  }
  0x51   : > { %s767_s14 = sshll.u32 (!%p1287_p8), %s1363_s19, 3  ;;  %s296_s8 = scalar_lea.sflag (!%p1287_p8), [#allocation3], %s1363_s19 }
  0x52   : > { %s299_s11 = scalar_lea.vmem (!%p1287_p8), [#allocation2], %s767_s14  ;;  %p1526_p3 = scmp.ne.s32.totalorder (!%p1287_p8), %s1517_s29, 0 }
  0x55   : > { %1146 = dma.done.wait (%p1526_p3), %s296_s8, 128  }
  0x56   : > { %1148 = vsyncadd (%p1526_p3), %s296_s8, 4294967168  ;;  %p1527_p10 = scmp.eq.s32.totalorder %s1266_s27, 0 }
  0x58   : > { %1150 = dma.done.wait (%p1527_p10), [#allocation6], 512   ;;  %p1528_p7 = pmov %p1527_p10 }
  0x5a   : > { %1152 = vsyncadd (%p1528_p7), [#allocation6], 4294966784  ;;  %p1529_p8 = pmov %p1528_p7 }
  0x5b   : > { %p1530_p11 = pmov %p1528_p7 }
  0x5c   : > { %1154 = dma.done.wait (%p1529_p8), [#allocation9], 256  }
  0x5d   : > { %1156 = vsyncadd (%p1530_p11), [#allocation9], 4294967040  ;;  %v1195_v0 = vmov 0.0   ;;  %vm1196_vm0 = vmmov 0   ;;  %v931_v1 = vld [vmem:[#allocation5 + $0x8] sm:$0xff]   ;;  %v932_v2 = vld [vmem:[#allocation7 + $0x8] sm:$0xff]  }
  0x5e   : > { %800 = vmatprep.subr.bf16.mxu0 %v1195_v0  ;;  %808 = vmatprep.subr.bf16.mxu1 %v1195_v0  ;;  %v933_v3 = vld [vmem:[#allocation5] sm:$0xff]   ;;  %v351_v4 = vld [vmem:[%s299_s11] sm:$0xff]  ;;  %vm369_vm1 = vcmask 261120   ;;  %v935_v7 = vld [vmem:[#allocation8 + $0x8] sm:$0xff]   ;;  %s1383_s1 = sshll.u32 %s1363_s19, 2  ;;  %s1387_s28 = sshll.u32 %s1179_s24, 6 }
  0x5f   : > { %804 = vmatprep.mubr.msk.bf16.mxu0 %vm1196_vm0, %v1195_v0  ;;  %812 = vmatprep.mubr.msk.bf16.mxu1 %vm1196_vm0, %v1195_v0  ;;  %v934_v5 = vld [vmem:[#allocation7] sm:$0xff]   ;;  %v352_v6 = vpack.c.bf16 %v351_v4, %v351_v4  ;;  %v936_v8 = vld [vmem:[#allocation8] sm:$0xff]   ;;  %s335_s29 = scalar_lea.vmem [#allocation10], %s1383_s1  ;;  %s342_s9 = scalar_lea.vmem [#allocation11], %s1383_s1  ;;  %vm414_vm2 = vcmask 519168  }
  0x60   : > { %801 = vmatpush3.bf16.msra.mxu0 %v931_v1  ;;  %809 = vmatpush3.bf16.msra.mxu1 %v932_v2  ;;  %s557_s7 = sshll.u32 %s335_s29, 4  ;;  %s571_s13 = sshll.u32 %s342_s9, 4  ;;  %s1397_s7 = int_to_ptr.vmem [resolvable:$true] %s557_s7  ;;  %s1405_s13 = int_to_ptr.vmem [resolvable:$true] %s571_s13 }
  0x61   : > { %802 = vmatprep.subr.bf16.mxu0 %v1195_v0  ;;  %810 = vmatprep.subr.bf16.mxu1 %v1195_v0  ;;  %s1395_s12 = scalar_lea.hbm %s1509_s4, %s1387_s28  ;;  %s1403_s14 = scalar_lea.hbm %s1510_s5, %s1387_s28 }
  0x62   : > { %s533_s8 = scalar_lea.sflag [#allocation4], %s1363_s19  ;;  %s1043_s11 = scalar_lea.vmem %s1397_s7, 64 }
  0x63   : > { %p1044_p1 = scmp.ne.s32.totalorder %s1397_s7, %s1043_s11  ;;  %s1197_s15 = smov [#allocation10]  }
  0x64   : > { %803 = vmatpush3.bf16.msra.mxu0 %v933_v3  ;;  %811 = vmatpush3.bf16.msra.mxu1 %v934_v5  ;;  %s1047_s20 = sshll.u32 %s1197_s15, 4  ;;  %s1048_s20 = int_to_ptr.vmem [resolvable:$false] %s1047_s20 }
  0x65   : > { %816 = vmatprep.subr.bf16.mxu0 %v1195_v0  ;;  %p1045_p9 = pnand %p1044_p1, %p1333_p5  ;;  %s1049_s24 = scalar_lea.vmem %s1048_s20, 128 }
  0x66   : > { %p1050_p2 = scmp.lt.s32.totalorder %s1397_s7, %s1048_s20  ;;  %p1051_p4 = scmp.lt.s32.totalorder %s1049_s24, %s1043_s11 }
  0x67   : > { %805 = vmatmul.mubr.msk.bf16.vlgmr.msra.gmra.mxu0 %vm369_vm1, %v352_v6  ;;  %813 = vmatmul.mubr.msk.bf16.vlgmr.msra.gmra.mxu1 %vm369_vm1, %v352_v6  ;;  %p1046_p13 = pneg %p1045_p9 }
  0x68   : > { %817 = vmatpush3.bf16.msra.mxu0 %v935_v7  ;;  %820 = vmatprep.mubr.msk.bf16.mxu0 %vm1196_vm0, %v1195_v0  ;;  %p1052_p6 = por %p1051_p4, %p1050_p2 }
  0x69   : > { %818 = vmatprep.subr.bf16.mxu0 %v1195_v0 }
  0x6a   : > { %p1053_p12 = pnand %p1052_p6, %p1046_p13 }
  0x6c   : > { %819 = vmatpush3.bf16.msra.mxu0 %v936_v8 }
  0x6f   : > { %821 = vmatmul.mubr.msk.bf16.vlgmr.msra.gmra.mxu0 %vm369_vm1, %v352_v6 }
 0x127   : > { %v407_v9 = vpop.f32.mrf.mxu0  ;;  %v466_v11 = vpop.f32.mrf.mxu1 }
 0x128   : > { %v413_v10 = vpack.c.bf16 %v407_v9, %v407_v9  ;;  %v472_v13 = vpack.c.bf16 %v466_v11, %v466_v11 }
 0x129   : > { %v806_v12 = vpop.f32.mrf.mxu0  ;;  %v814_v14 = vpop.f32.mrf.mxu1 }
 0x12a   : > { %415 = vst.msk [vmem:[%s335_s29] sm:$0xf] %vm414_vm2, %v413_v10  ;;  %473 = vst.msk [vmem:[%s342_s9] sm:$0xf] %vm414_vm2, %v472_v13 }
 0x12b   : > { %v410_v15 = vpop.f32.mrf.mxu0 }
 0x12c   : > { %1056 = shalt.err (!%p1053_p12)
}
 0x12d   : > { %s1057_s29 = scalar_lea.hbm %s1395_s12, 64  ;;  %s1061_s16 = scalar_lea.hbm %s1509_s4, 128 }
 0x12e   : > { %p1058_p0 = scmp.ne.s32.totalorder %s1395_s12, %s1057_s29  ;;  %p1062_p7 = scmp.lt.s32.totalorder %s1395_s12, %s1509_s4 }
 0x12f   : > { %p1063_p8 = scmp.lt.s32.totalorder %s1061_s16, %s1057_s29 }
 0x130   : > { %p1059_p3 = pnand %p1058_p0, %p1333_p5 }
 0x131   : > { %p1064_p11 = por %p1063_p8, %p1062_p7 }
 0x132   : > { %p1060_p10 = pneg %p1059_p3 }
 0x134   : > { %p1065_p1 = pnand %p1064_p11, %p1060_p10 }
 0x136   : > { %1068 = shalt.err (!%p1065_p1)
}
 0x137   : > { %838 = dma.vmem_to_hbm [thread:$0]  (%p1333_p5), %s1397_s7, 64, %s1395_s12, %s533_s8   ;;  %v469_v16 = vpop.f32.mrf.mxu1 }
 0x138   : > { %s1531_s11 = sand.u32 1, %s1266_s27   ;;  %s1069_s2 = scalar_lea.vmem %s1405_s13, 64 }
 0x139   : > { %s1432_s20 = scalar_lea.sflag [#allocation12], %s1531_s11  ;;  %p1070_p9 = scmp.ne.s32.totalorder %s1405_s13, %s1069_s2 }
 0x13a   : > { %s1198_s24 = smov [#allocation11]  }
 0x13b   : > { %p1071_p13 = pnand %p1070_p9, %p1333_p5  ;;  %s1073_s29 = sshll.u32 %s1198_s24, 4  ;;  %s1074_s29 = int_to_ptr.vmem [resolvable:$false] %s1073_s29 }
 0x13c   : > { %s1075_s19 = scalar_lea.vmem %s1074_s29, 128  ;;  %p1076_p4 = scmp.lt.s32.totalorder %s1405_s13, %s1074_s29 }
 0x13d   : > { %p1072_p2 = pneg %p1071_p13  ;;  %p1077_p6 = scmp.lt.s32.totalorder %s1075_s19, %s1069_s2 }
 0x13f   : > { %p1078_p12 = por %p1077_p6, %p1076_p4 }
 0x141   : > { %p1079_p0 = pnand %p1078_p12, %p1072_p2 }
 0x143   : > { %1082 = shalt.err (!%p1079_p0)
}
 0x144   : > { %s1083_s27 = scalar_lea.hbm %s1403_s14, 64  ;;  %s1087_s8 = scalar_lea.hbm %s1510_s5, 128 }
 0x145   : > { %p1084_p3 = scmp.ne.s32.totalorder %s1403_s14, %s1083_s27  ;;  %p1088_p8 = scmp.lt.s32.totalorder %s1403_s14, %s1510_s5 }
 0x146   : > { %p1089_p11 = scmp.lt.s32.totalorder %s1087_s8, %s1083_s27 }
 0x147   : > { %p1085_p10 = pnand %p1084_p3, %p1333_p5 }
 0x148   : > { %p1090_p1 = por %p1089_p11, %p1088_p8 }
 0x149   : > { %p1086_p7 = pneg %p1085_p10 }
 0x14b   : > { %p1091_p9 = pnand %p1090_p1, %p1086_p7 }
 0x14d   : > { %1094 = shalt.err (!%p1091_p9)
}
 0x14e   : > { %839 = dma.vmem_to_hbm [thread:$0]  (%p1333_p5), %s1405_s13, 64, %s1403_s14, %s1432_s20   ;;  %v807_v17 = vpop.f32.mrf.mxu0  ;;  %v815_v18 = vpop.f32.mrf.mxu1 }
 0x14f   : > { %s349_s15 = scalar_lea.vmem [#allocation13], %s1383_s1  ;;  %s1460_s29 = scalar_lea.hbm %s1511_s6, %s1387_s28 }
 0x150   : > { %s585_s11 = sshll.u32 %s349_s15, 4  ;;  %v524_v19 = vpop.f32.mrf.mxu0  ;;  %s1199_s1 = smov [#allocation13]   ;;  %s586_s11 = int_to_ptr.vmem [resolvable:$true] %s585_s11 }
 0x151   : > { %v530_v20 = vpack.c.bf16 %v524_v19, %v524_v19  ;;  %s1095_s19 = scalar_lea.vmem %s586_s11, 64  ;;  %s1099_s13 = sshll.u32 %s1199_s1, 4  ;;  %s1100_s13 = int_to_ptr.vmem [resolvable:$false] %s1099_s13 }
 0x152   : > { %v822_v21 = vpop.f32.mrf.mxu0  ;;  %p1096_p13 = scmp.ne.s32.totalorder %s586_s11, %s1095_s19  ;;  %s1101_s14 = scalar_lea.vmem %s1100_s13, 128 }
 0x153   : > { %531 = vst.msk [vmem:[%s349_s15] sm:$0xf] %vm414_vm2, %v530_v20  ;;  %p1102_p6 = scmp.lt.s32.totalorder %s586_s11, %s1100_s13  ;;  %p1103_p12 = scmp.lt.s32.totalorder %s1101_s14, %s1095_s19 }
 0x154   : > { %v527_v22 = vpop.f32.mrf.mxu0  ;;  %p1097_p2 = pnand %p1096_p13, %p1333_p5 }
 0x155   : > { %p1104_p0 = por %p1103_p12, %p1102_p6 }
 0x156   : > { %p1098_p4 = pneg %p1097_p2 }
 0x158   : > { %p1105_p3 = pnand %p1104_p0, %p1098_p4 }
 0x15a   : > { %1108 = shalt.err (!%p1105_p3)
}
 0x15b   : > { %s1109_s28 = scalar_lea.hbm %s1460_s29, 64  ;;  %s1113_s12 = scalar_lea.hbm %s1511_s6, 128 }
 0x15c   : > { %p1110_p10 = scmp.ne.s32.totalorder %s1460_s29, %s1109_s28  ;;  %p1114_p11 = scmp.lt.s32.totalorder %s1460_s29, %s1511_s6 }
 0x15d   : > { %p1115_p1 = scmp.lt.s32.totalorder %s1113_s12, %s1109_s28 }
 0x15e   : > { %p1111_p7 = pnand %p1110_p10, %p1333_p5 }
 0x15f   : > { %p1116_p9 = por %p1115_p1, %p1114_p11 }
 0x160   : > { %p1112_p8 = pneg %p1111_p7 }
 0x162   : > { %p1117_p13 = pnand %p1116_p9, %p1112_p8 }
 0x164   : > { %1120 = shalt.err (!%p1117_p13)
}
 0x165   : > { %840 = dma.vmem_to_hbm [thread:$0]  (%p1333_p5), %s586_s11, 64, %s1460_s29, %s1432_s20   ;;  %v823_v23 = vpop.f32.mrf.mxu0 }
 0x166 PF: > { %s597_s16 = sand.u32 1, %s1167_s21   ;;  %p1532_p2 = scmp.ne.s32.totalorder %s1518_s30, 0 }
 0x167   : > { %p1533_p4 = scmp.ge.s32.totalorder %s1187_s26, 2  ;;  %s598_s15 = scalar_lea.sflag [#allocation4], %s597_s16 }
 0x169   : > { %p859_p6 = pnand %p1533_p4, %p1532_p2 }
 0x16b   : > { %p860_p12 = pneg %p859_p6 }
 0x16d   : > { %1158 = dma.done.wait (%p860_p12), %s598_s15, 64  }
 0x16e   : > { %1160 = vsyncadd (%p860_p12), %s598_s15, 4294967232  ;;  %s1534_s2 = sadd.s32 4294967294, %s1187_s26  }
 0x16f   : > { %s606_s24 = sand.u32 1, %s1534_s2  }
 0x170   : > { %s607_s10 = scalar_lea.sflag [#allocation12], %s606_s24 }
 0x171   : > { %1162 = dma.done.wait (%p860_p12), %s607_s10, 128  }
 0x172   : > { %1164 = vsyncadd (%p860_p12), %s607_s10, 4294967168  ;;  %s28_s26 = sadd.s32 1, %s1187_s26   ;;  %s1535_s21 = smov %s1171_s22 }
 0x173   : > { %p25_p5 = scmp.ge.s32.totalorder %s28_s26, 4   ;;  %s1536_s22 = smov %s1175_s23 }
 0x174   : > { %s1537_s23 = smov %s1345_s17  ;;  %s1538_s24 = smov %s1183_s25 }
 0x175   : > { %s1539_s25 = smov %s1541_s18  ;;  %27 = sbr.rel (!%p25_p5) target bundleno = 13 (0xd), region = 125 }
 0x17a   :  { %621 = vsyncpa [#allocation3], 1 }
 0x17b   :  { %623 = vsyncpa [#allocation3 + $0x1], 1 }
 0x17c   :  { %624 = vsyncpa [#allocation6], 1 }
 0x17d   :  { %625 = vsyncpa [#allocation9], 1 }
 0x17e   :  { %626 = vsyncpa [#allocation4], 1 }
 0x17f   :  { %628 = vsyncpa [#allocation4 + $0x1], 1 }
 0x180   :  { %629 = vsyncpa [#allocation12], 1 }
 0x181   :  { %631 = vsyncpa [#allocation12 + $0x1], 1 }

</bundles_post_ra>
